<compile_context>
chip_gen: v6e
topology: v6e:2x2x1
jax: 0.10.0
libtpu: 0.0.40
codegen_flags: <defaults>
</compile_context>

<pallas_src>
import jax
import jax.numpy as jnp
import numpy as np
from jax.experimental import pallas as pl
from jax.experimental.pallas import tpu as pltpu

LANES = 128
ROW_WIDTH = 3 * LANES            # 384 f32 lanes = 128 interleaved xyz points per row
POINTS_ALIGN = 8 * LANES         # 1024 points -> M (row count) is a multiple of 8
TARGET_BLOCKS = 8                # enough grid steps to overlap DMA/compute & split TCs
MIN_ROWS = 512                   # >= ~0.75 MiB per block -> per-step overhead is small
MAX_ROWS = 4096                  # 6 MiB per block; 24 MiB double-buffered (v7x-safe)
VMEM_LIMIT_BYTES = 48 * 1024 * 1024


# ----------------------------------------------------------------------------- helpers

def _rotation_matrix(weight):
    """(3, 1) Euler angles -> 3x3 rotation matrix, matching the torch forward."""
    a = weight[0, 0]
    b = weight[1, 0]
    c = weight[2, 0]
    ca, sa = jnp.cos(a), jnp.sin(a)
    cb, sb = jnp.cos(b), jnp.sin(b)
    cc, sc = jnp.cos(c), jnp.sin(c)
    row0 = jnp.stack([cc * cb, sa * sb * cc - ca * sc, ca * sb * cc + sa * sc])
    row1 = jnp.stack([cb * sc, sa * sb * sc + ca * cc, ca * sb * sc - sa * cc])
    row2 = jnp.stack([-sb, sa * cb, ca * cb])
    return jnp.stack([row0, row1, row2]).astype(jnp.float32)        # (3, 3)


def _interleaved_coeffs(rot):
    """Per-lane coefficient table for the interleaved kernel.

    Lane j holds coordinate r = j % 3 of point j // 3.  The rotated value is
        out[j] = sum_d coeff[d][j] * v[j + d],   d in {-2,...,+2},
    with coeff[d][j] = R[r, r + d] when 0 <= r + d <= 2 else 0.  Row i of the
    returned (8, 384) table corresponds to offset d = i - 2 (rows 5..7 are pad).
    Zero coefficients at the row edges make the cyclic roll wrap-around harmless.
    """
    lane = jnp.arange(ROW_WIDTH)
    r = lane % 3
    rows = []
    for d in (-2, -1, 0, 1, 2):
        k = r + d
        valid = (k >= 0) & (k <= 2)
        rows.append(jnp.where(valid, rot[r, jnp.clip(k, 0, 2)], 0.0))
    c = jnp.stack(rows).astype(jnp.float32)                          # (5, 384)
    return jnp.pad(c, ((0, 3), (0, 0)))                              # (8, 384)


def _choose_rows(m, *, min_rows=MIN_ROWS, max_rows=MAX_ROWS):
    """Rows per block: >= TARGET_BLOCKS blocks, block >= min_rows, <= max_rows."""
    rows = max(-(-m // TARGET_BLOCKS), min(min_rows, m))
    rows = min(rows, max_rows)
    return ((rows + 7) // 8) * 8


# ----------------------------------------------------------------------------- kernels

def _rot_interleaved_kernel(c_ref, x_ref, o_ref):
    # c_ref: (8, 384) resident coefficient table (row i <-> lane offset d = i - 2).
    # x_ref / o_ref: (rows, 384) f32 blocks of xyz-interleaved points (lane-dense).
    c_m2 = c_ref[0:1, :]
    c_m1 = c_ref[1:2, :]
    c_0 = c_ref[2:3, :]
    c_p1 = c_ref[3:4, :]
    c_p2 = c_ref[4:5, :]

    v = x_ref[...]
    # neighbour at lane offset +d  ==  roll by -d (cyclic; wrapped lanes have 0 coeff)
    out = c_0 * v
    out += c_p1 * pltpu.roll(v, shift=ROW_WIDTH - 1, axis=1)   # v[j + 1]
    out += c_p2 * pltpu.roll(v, shift=ROW_WIDTH - 2, axis=1)   # v[j + 2]
    out += c_m1 * pltpu.roll(v, shift=1, axis=1)               # v[j - 1]
    out += c_m2 * pltpu.roll(v, shift=2, axis=1)               # v[j - 2]
    o_ref[...] = out


def _rot_planar_kernel(r_ref, x_ref, o_ref):
    # r_ref: SMEM (9,) f32 rotation entries (scalar prefetch).
    # x_ref / o_ref: VMEM (3, rows, 128) f32 coordinate planes (lane-dense).
    r00 = r_ref[0]; r01 = r_ref[1]; r02 = r_ref[2]
    r10 = r_ref[3]; r11 = r_ref[4]; r12 = r_ref[5]
    r20 = r_ref[6]; r21 = r_ref[7]; r22 = r_ref[8]

    x0 = x_ref[0]
    x1 = x_ref[1]
    x2 = x_ref[2]

    o_ref[0] = r00 * x0 + r01 * x1 + r02 * x2
    o_ref[1] = r10 * x0 + r11 * x1 + r12 * x2
    o_ref[2] = r20 * x0 + r21 * x1 + r22 * x2


# ----------------------------------------------------------------------------- wrappers

def my_layer_rotation_interleaved(weight, x_rows, *, min_rows=MIN_ROWS,
                                  max_rows=MAX_ROWS):
    """Zero-glue fast path on xyz-interleaved rows.

    x_rows: (M, 384) f32, row r holds points [128r, 128r+128) as x,y,z,x,y,z,...
    (i.e. the natural (N, 3) row-major buffer viewed 128 points per row).
    Returns rotated rows of the same shape / layout.
    """
    m, w = x_rows.shape
    assert w == ROW_WIDTH and m >= 1
    coeffs = _interleaved_coeffs(_rotation_matrix(weight))          # (8, 384), resident
    rows = _choose_rows(m, min_rows=min_rows, max_rows=max_rows)
    n_blocks = -(-m // rows)                                        # ragged tail is OK

    return pl.pallas_call(
        _rot_interleaved_kernel,
        out_shape=jax.ShapeDtypeStruct((m, ROW_WIDTH), jnp.float32),
        grid=(n_blocks,),
        in_specs=[
            pl.BlockSpec((8, ROW_WIDTH), lambda i: (0, 0)),          # coeff table, resident
            pl.BlockSpec((rows, ROW_WIDTH), lambda i: (i, 0)),
        ],
        out_specs=pl.BlockSpec((rows, ROW_WIDTH), lambda i: (i, 0)),
        compiler_params=pltpu.CompilerParams(
            # NOTE(v7x): if profiling shows a single TC doing all steps, switch
            # this axis to pltpu.CORE_PARALLEL to force the 2-TC split.
            dimension_semantics=("parallel",),
            vmem_limit_bytes=VMEM_LIMIT_BYTES,
        ),
    )(coeffs, x_rows)


def my_layer_rotation_planar(weight, x_planes, *, min_rows=MIN_ROWS,
                             max_rows=MAX_ROWS):
    """Planar fast path for callers that keep (3, M, 128) coordinate planes."""
    three, m, lanes = x_planes.shape
    assert three == 3 and lanes == LANES and m % 8 == 0
    r = _rotation_matrix(weight).reshape(9)                          # -> SMEM prefetch
    rows = _choose_rows(m, min_rows=min_rows, max_rows=max_rows)
    n_blocks = -(-m // rows)

    return pl.pallas_call(
        _rot_planar_kernel,
        out_shape=jax.ShapeDtypeStruct((3, m, LANES), jnp.float32),
        grid_spec=pltpu.PrefetchScalarGridSpec(
            num_scalar_prefetch=1,                                   # r -> SMEM
            grid=(n_blocks,),
            in_specs=[pl.BlockSpec((3, rows, LANES), lambda i, r: (0, i, 0))],
            out_specs=pl.BlockSpec((3, rows, LANES), lambda i, r: (0, i, 0)),
        ),
        compiler_params=pltpu.CompilerParams(
            dimension_semantics=("parallel",),
            vmem_limit_bytes=VMEM_LIMIT_BYTES,
        ),
    )(r, x_planes)


def my_layer_rotation(weight, x, *, min_rows=MIN_ROWS, max_rows=MAX_ROWS):
    """weight: (3, 1) f32 Euler angles; x: (N, 3) points -> (N, 3) rotated.

    Matches the PyTorch module API.  When N is a multiple of 1024 the only
    wrapper ops are free row-major reshapes (zero extra HBM traffic); otherwise
    one contiguous pad copy (input) and one tail slice (output) remain.
    Compute is float32; the result is cast back to x.dtype.
    """
    n = x.shape[0]
    xf = x.astype(jnp.float32)
    n_pad = -(-max(n, 1) // POINTS_ALIGN) * POINTS_ALIGN
    if n_pad != n:
        xf = jnp.pad(xf, ((0, n_pad - n), (0, 0)))                   # contiguous copy
    x_rows = xf.reshape(n_pad // LANES, ROW_WIDTH)                    # free reshape

    out_rows = my_layer_rotation_interleaved(weight, x_rows,
                                             min_rows=min_rows, max_rows=max_rows)

    out = out_rows.reshape(n_pad, 3)                                  # free reshape
    if n_pad != n:
        out = out[:n]
    return out.astype(x.dtype)


# ----------------------------------------------------------------------------- reference

def ref_forward(weight, x):
    """Plain-JAX mirror of the PyTorch forward, for validation."""
    R = _rotation_matrix(weight)
    return (R @ x.astype(jnp.float32).T).T


# ----------------------------------------------------------------------------- tests

if __name__ == "__main__":
    key = jax.random.PRNGKey(0)

    # Deterministic init, matching the module: torch.nn.init.zeros_(weight).
    weight0 = jnp.zeros((3, 1), dtype=jnp.float32)

    # Small batch of 3D points, as the forward implies.
    N = 8
    x = jax.random.normal(key, (N, 3), dtype=jnp.float32)

    out = jax.block_until_ready(my_layer_rotation(weight0, x))
    assert out.shape == x.shape and out.dtype == x.dtype
    np.testing.assert_allclose(np.asarray(out), np.asarray(ref_forward(weight0, x)),
                               rtol=1e-6, atol=1e-6)

    # Non-trivial rotation, same path.
    w2 = jnp.array([[0.3], [-0.7], [1.1]], dtype=jnp.float32)
    out2 = jax.block_until_ready(my_layer_rotation(w2, x))
    np.testing.assert_allclose(np.asarray(out2), np.asarray(ref_forward(w2, x)),
                               rtol=1e-5, atol=1e-5)

    # Unaligned N (pad + slice path), multi-block grid and ragged last block
    # (small min/max_rows so the shapes stay tiny).
    x3 = jax.random.normal(jax.random.PRNGKey(1), (3000, 3), dtype=jnp.float32)
    out3 = jax.block_until_ready(my_layer_rotation(w2, x3, min_rows=8, max_rows=8))
    np.testing.assert_allclose(np.asarray(out3), np.asarray(ref_forward(w2, x3)),
                               rtol=1e-5, atol=1e-5)
    out3r = jax.block_until_ready(my_layer_rotation(w2, x3, min_rows=16, max_rows=16))
    np.testing.assert_allclose(np.asarray(out3r), np.asarray(ref_forward(w2, x3)),
                               rtol=1e-5, atol=1e-5)

    # Aligned N (zero-glue path).
    x4 = jax.random.normal(jax.random.PRNGKey(2), (4096, 3), dtype=jnp.float32)
    out4 = jax.block_until_ready(my_layer_rotation(w2, x4))
    np.testing.assert_allclose(np.asarray(out4), np.asarray(ref_forward(w2, x4)),
                               rtol=1e-5, atol=1e-5)

    # Planar fast path.
    x_planes = jnp.transpose(x4).reshape(3, 32, LANES)
    outp = jax.block_until_ready(my_layer_rotation_planar(w2, x_planes))
    ref_p = jnp.transpose(ref_forward(w2, x4)).reshape(3, 32, LANES)
    np.testing.assert_allclose(np.asarray(outp), np.asarray(ref_p),
                               rtol=1e-5, atol=1e-5)

    print("KERNEL_OK")
</pallas_src>

<mosaic_0001>
module attributes {stable_mosaic.version = 11 : i64} {
  func.func @_rot_interleaved_kernel(%arg0: i32, %arg1: memref<8x384xf32, #tpu.memory_space<vmem>>, %arg2: memref<8x384xf32, #tpu.memory_space<vmem>>, %arg3: memref<8x384xf32, #tpu.memory_space<vmem>>) attributes {dimension_semantics = [#tpu.dimension_semantics<parallel>], iteration_bounds = array<i64: 1>, scalar_prefetch = 0 : i64, scratch_operands = 0 : i64, tpu.core_type = #tpu.core_type<tc>, window_params = [{pipeline_mode = #tpu.pipeline_mode<synchronous>, transform_indices = @transform_0, window_bounds = array<i64: 8, 384>}, {transform_indices = @transform_1, window_bounds = array<i64: 8, 384>}, {transform_indices = @transform_2, window_bounds = array<i64: 8, 384>}]} {
    %c0 = arith.constant 0 : index
    %c0_0 = arith.constant 0 : index
    %0 = vector.load %arg1[%c0, %c0_0] : memref<8x384xf32, #tpu.memory_space<vmem>>, vector<1x384xf32>
    %c1 = arith.constant 1 : index
    %c0_1 = arith.constant 0 : index
    %1 = vector.load %arg1[%c1, %c0_1] : memref<8x384xf32, #tpu.memory_space<vmem>>, vector<1x384xf32>
    %c2 = arith.constant 2 : index
    %c0_2 = arith.constant 0 : index
    %2 = vector.load %arg1[%c2, %c0_2] : memref<8x384xf32, #tpu.memory_space<vmem>>, vector<1x384xf32>
    %c3 = arith.constant 3 : index
    %c0_3 = arith.constant 0 : index
    %3 = vector.load %arg1[%c3, %c0_3] : memref<8x384xf32, #tpu.memory_space<vmem>>, vector<1x384xf32>
    %c4 = arith.constant 4 : index
    %c0_4 = arith.constant 0 : index
    %4 = vector.load %arg1[%c4, %c0_4] : memref<8x384xf32, #tpu.memory_space<vmem>>, vector<1x384xf32>
    %c0_5 = arith.constant 0 : index
    %c0_6 = arith.constant 0 : index
    %5 = vector.load %arg2[%c0_5, %c0_6] : memref<8x384xf32, #tpu.memory_space<vmem>>, vector<8x384xf32>
    %6 = vector.broadcast %2 : vector<1x384xf32> to vector<8x384xf32>
    %7 = arith.mulf %6, %5 : vector<8x384xf32>
    %c383_i32 = arith.constant 383 : i32
    %8 = tpu.dynamic_rotate %5 by %c383_i32 dim 1 : vector<8x384xf32>, i32 -> vector<8x384xf32>
    %9 = vector.broadcast %3 : vector<1x384xf32> to vector<8x384xf32>
    %10 = arith.mulf %9, %8 : vector<8x384xf32>
    %11 = arith.addf %7, %10 : vector<8x384xf32>
    %c382_i32 = arith.constant 382 : i32
    %12 = tpu.dynamic_rotate %5 by %c382_i32 dim 1 : vector<8x384xf32>, i32 -> vector<8x384xf32>
    %13 = vector.broadcast %4 : vector<1x384xf32> to vector<8x384xf32>
    %14 = arith.mulf %13, %12 : vector<8x384xf32>
    %15 = arith.addf %11, %14 : vector<8x384xf32>
    %c1_i32 = arith.constant 1 : i32
    %16 = tpu.dynamic_rotate %5 by %c1_i32 dim 1 : vector<8x384xf32>, i32 -> vector<8x384xf32>
    %17 = vector.broadcast %1 : vector<1x384xf32> to vector<8x384xf32>
    %18 = arith.mulf %17, %16 : vector<8x384xf32>
    %19 = arith.addf %15, %18 : vector<8x384xf32>
    %c2_i32 = arith.constant 2 : i32
    %20 = tpu.dynamic_rotate %5 by %c2_i32 dim 1 : vector<8x384xf32>, i32 -> vector<8x384xf32>
    %21 = vector.broadcast %0 : vector<1x384xf32> to vector<8x384xf32>
    %22 = arith.mulf %21, %20 : vector<8x384xf32>
    %23 = arith.addf %19, %22 : vector<8x384xf32>
    %c0_7 = arith.constant 0 : index
    %c0_8 = arith.constant 0 : index
    %24 = vector.load %arg3[%c0_7, %c0_8] : memref<8x384xf32, #tpu.memory_space<vmem>>, vector<8x384xf32>
    tpu.vector_store %arg3[%c0_7, %c0_8], %23 {strides = array<i32>} : memref<8x384xf32, #tpu.memory_space<vmem>>, vector<8x384xf32>,
    return
  }
  func.func @transform_0(%arg0: i32) -> (i32, i32) {
    %c0_i32 = arith.constant 0 : i32
    %c0_i32_0 = arith.constant 0 : i32
    %c0_i32_1 = arith.constant 0 : i32
    return %c0_i32, %c0_i32_0 : i32, i32
  }
  func.func @transform_1(%arg0: i32) -> (i32, i32) {
    %c0_i32 = arith.constant 0 : i32
    %c0_i32_0 = arith.constant 0 : i32
    return %arg0, %c0_i32 : i32, i32
  }
  func.func @transform_2(%arg0: i32) -> (i32, i32) {
    %c0_i32 = arith.constant 0 : i32
    %c0_i32_0 = arith.constant 0 : i32
    return %arg0, %c0_i32 : i32, i32
  }
}

</mosaic_0001>

<bundles_post_ra>
// kernel: tpu_custom_call.1
= control target key start
LH: loop header
LB: loop body
LE: loop exit
PB: predicated region body
PF: predicated region fallthrough
CT: control target
= control target key end

     0   :  { %7 = vsyncpa [#allocation3], 0  ;;  %s371_s0 = inlined_call_operand.hbm [shape: f32[8,384], index: 0, kind: input, shape index: {}]   ;;  %s372_s1 = inlined_call_operand.hbm [shape: f32[8,384], index: 1, kind: input, shape index: {}]   ;;  %s373_s2 = inlined_call_operand.hbm [shape: f32[8,384], index: 2, kind: output, shape index: {}]  }
   0x1   :  { %8 = vsyncpa [#allocation6], 0 }
   0x2   :  { %9 = vsyncpa [#allocation4], 0  ;;  %s289_s9 = smov [#allocation2]   ;;  %s290_s11 = smov [#allocation5]  }
   0x3   :  { %s16_s10 = sshll.u32 %s289_s9, 4  ;;  %s26_s12 = sshll.u32 %s290_s11, 4  ;;  %s17_s10 = int_to_ptr.vmem [resolvable:$true] %s16_s10  ;;  %s27_s12 = int_to_ptr.vmem [resolvable:$true] %s26_s12 }
   0x4   :  { %s231_s13 = scalar_lea.vmem %s17_s10, 384  ;;  %p236_p1 = scmp.lt.s32.totalorder %s17_s10, %s17_s10 }
   0x5   :  { %p232_p0 = scmp.ne.s32.totalorder %s17_s10, %s231_s13  ;;  %p237_p2 = scmp.lt.s32.totalorder %s231_s13, %s231_s13 }
   0x7   :  { %p238_p3 = por %p237_p2, %p236_p1 }
   0x9   :  { %p239_p4 = pnand %p238_p3, %p232_p0 }
   0xb   :  { %242 = shalt.err (!%p239_p4)
}
   0xc   :  { %19 = dma.hbm_to_vmem [thread:$0]  %s371_s0, 384, %s17_s10, [#allocation3]  }
   0xd   :  { %s251_s16 = scalar_lea.vmem %s27_s12, 384  ;;  %p256_p6 = scmp.lt.s32.totalorder %s27_s12, %s27_s12 }
   0xe   :  { %p252_p5 = scmp.ne.s32.totalorder %s27_s12, %s251_s16  ;;  %p257_p7 = scmp.lt.s32.totalorder %s251_s16, %s251_s16 }
  0x10   :  { %p258_p8 = por %p257_p7, %p256_p6 }
  0x12   :  { %p259_p9 = pnand %p258_p8, %p252_p5 }
  0x14   :  { %262 = shalt.err (!%p259_p9)
}
  0x15   :  { %29 = dma.hbm_to_vmem [thread:$0]  %s372_s1, 384, %s27_s12, [#allocation6]  }
  0x16   :  { %283 = dma.done.wait [#allocation3], 384  }
  0x17   :  { %284 = vsyncadd [#allocation3], 4294966912 }
  0x18   :  { %285 = dma.done.wait [#allocation6], 384  }
  0x19   :  { %286 = vsyncadd [#allocation6], 4294966912  ;;  %v47_v0 = vld [vmem:[#allocation5 + $0x10] sm:$0xff]  ;;  %v45_v1 = vld [vmem:[#allocation5] sm:$0xff]  ;;  %s291_s19 = smov 127   ;;  %s292_s0 = smov 126   ;;  %v49_v3 = vlaneseq }
  0x1a   :  { %71 = vrot.lane.b32.xlu1 %v47_v0, %s291_s19  ;;  %67 = vrot.lane.b32.xlu0 %v45_v1, %s291_s19  ;;  %v46_v2 = vld [vmem:[#allocation5 + $0x8] sm:$0xff]  ;;  %s293_s20 = smov 1   ;;  %s294_s21 = smov 2  }
  0x1b   :  { %v50_v4 = vshrl.u32 %v49_v3, 7  ;;  %v319_v8 = vand.u32 127, %v49_v3  ;;  %v40_v9 = vld [vmem:[#allocation2 + $0x2] ss:$8 sm:$0x7]  ;;  %s295_s1 = smov [#allocation7]  }
  0x1c   :  { %v42_v14 = vld [vmem:[#allocation2 + $0x3] ss:$8 sm:$0x7]  ;;  %v44_v16 = vld [vmem:[#allocation2 + $0x4] ss:$8 sm:$0x7] }
  0x1d   :  { %v317_v7 = vsub.s32 2, %v50_v4  ;;  %v321_v11 = vsub.s32 1, %v50_v4  ;;  %v323_v13 = vsub.s32 0, %v50_v4  ;;  %vm75_vm0 = vcmp.lt.s32.totalorder %v319_v8, 127  ;;  %s206_s22 = sshll.u32 %s295_s1, 4  ;;  %s207_s22 = int_to_ptr.vmem [resolvable:$true] %s206_s22 }
  0x1e   :  { %101 = vrot.lane.b32.xlu1 %v45_v1, %s292_s0  ;;  %69 = vrot.lane.b32.xlu0 %v46_v2, %s291_s19  ;;  %vm107_vm1 = vcmp.lt.s32.totalorder %v319_v8, 126  ;;  %vm139_vm2 = vcmp.lt.s32.totalorder %v319_v8, 1  ;;  %v38_v24 = vld [vmem:[#allocation2 + $0x1] ss:$8 sm:$0x7]  ;;  %vm171_vm3 = vcmp.lt.s32.totalorder %v319_v8, 2  ;;  %p268_p11 = scmp.lt.s32.totalorder %s207_s22, %s207_s22 }
  0x1f   :  { %v60_v15 = vrot.slane %v40_v9, %v317_v7  ;;  %v56_v17 = vrot.slane %v40_v9, %v321_v11  ;;  %v87_v18 = vrot.slane %v42_v14, %v321_v11  ;;  %v52_v21 = vrot.slane %v40_v9, %v323_v13  ;;  %v36_v39 = vld [vmem:[#allocation2] ss:$8 sm:$0x7]  ;;  %s263_s23 = scalar_lea.vmem %s207_s22, 384 }
  0x20   :  { %v83_v23 = vrot.slane %v42_v14, %v323_v13  ;;  %v91_v25 = vrot.slane %v42_v14, %v317_v7  ;;  %v123_v27 = vrot.slane %v44_v16, %v317_v7  ;;  %v119_v28 = vrot.slane %v44_v16, %v321_v11  ;;  %p264_p10 = scmp.ne.s32.totalorder %s207_s22, %s263_s23  ;;  %p269_p12 = scmp.lt.s32.totalorder %s263_s23, %s263_s23 }
  0x21   :  { %v66_v29 = vmul.f32 %v60_v15, %v47_v0  ;;  %v115_v32 = vrot.slane %v44_v16, %v323_v13  ;;  %v65_v33 = vmul.f32 %v56_v17, %v46_v2  ;;  %v151_v38 = vrot.slane %v38_v24, %v321_v11 }
  0x22   :  { %105 = vrot.lane.b32.xlu1 %v47_v0, %s292_s0  ;;  %103 = vrot.lane.b32.xlu0 %v46_v2, %s292_s0  ;;  %v64_v40 = vmul.f32 %v52_v21, %v45_v1  ;;  %v147_v46 = vrot.slane %v38_v24, %v323_v13  ;;  %v155_v47 = vrot.slane %v38_v24, %v317_v7  ;;  %p270_p13 = por %p269_p12, %p268_p11 }
  0x23   :  { %v179_v49 = vrot.slane %v36_v39, %v323_v13  ;;  %v183_v55 = vrot.slane %v36_v39, %v321_v11  ;;  %v187_v59 = vrot.slane %v36_v39, %v317_v7 }
  0x24   :  { %p271_p0 = pnand %p270_p13, %p264_p10 }
  0x26   :  { %135 = vrot.lane.b32.xlu1 %v46_v2, %s293_s20  ;;  %133 = vrot.lane.b32.xlu0 %v45_v1, %s293_s20 }
  0x2a   :  { %165 = vrot.lane.b32.xlu1 %v45_v1, %s294_s21  ;;  %137 = vrot.lane.b32.xlu0 %v47_v0, %s293_s20 }
  0x2e   :  { %169 = vrot.lane.b32.xlu1 %v47_v0, %s294_s21  ;;  %167 = vrot.lane.b32.xlu0 %v46_v2, %s294_s21 }
  0x8c   :  { %v72_v5 = vpop.permute.xlu1 %71  ;;  %v68_v6 = vpop.permute.xlu0 %67 }
  0x8d   :  { %v78_v30 = vsel %vm75_vm0, %v72_v5, %v68_v6 }
  0x8e   :  { %v97_v44 = vmul.f32 %v91_v25, %v78_v30 }
  0x90   :  { %v102_v10 = vpop.permute.xlu1 %101  ;;  %v70_v12 = vpop.permute.xlu0 %69  ;;  %v100_v60 = vadd.f32 %v97_v44, %v66_v29 }
  0x91   :  { %v76_v22 = vsel %vm75_vm0, %v70_v12, %v72_v5  ;;  %v77_v26 = vsel %vm75_vm0, %v68_v6, %v70_v12 }
  0x92   :  { %v96_v34 = vmul.f32 %v87_v18, %v76_v22  ;;  %v95_v41 = vmul.f32 %v83_v23, %v77_v26 }
  0x94   :  { %v106_v19 = vpop.permute.xlu1 %105  ;;  %v104_v20 = vpop.permute.xlu0 %103  ;;  %v99_v50 = vadd.f32 %v96_v34, %v65_v33  ;;  %v98_v56 = vadd.f32 %v95_v41, %v64_v40 }
  0x95   :  { %v108_v31 = vsel %vm107_vm1, %v104_v20, %v106_v19  ;;  %v109_v35 = vsel %vm107_vm1, %v102_v10, %v104_v20  ;;  %v110_v42 = vsel %vm107_vm1, %v106_v19, %v102_v10 }
  0x96   :  { %v128_v45 = vmul.f32 %v119_v28, %v108_v31  ;;  %v127_v48 = vmul.f32 %v115_v32, %v109_v35  ;;  %v129_v51 = vmul.f32 %v123_v27, %v110_v42 }
  0x98   :  { %v136_v36 = vpop.permute.xlu1 %135  ;;  %v134_v37 = vpop.permute.xlu0 %133  ;;  %v131_v61 = vadd.f32 %v128_v45, %v99_v50  ;;  %v130_v0 = vadd.f32 %v127_v48, %v98_v56  ;;  %v132_v1 = vadd.f32 %v129_v51, %v100_v60 }
  0x99   :  { %v141_v43 = vsel %vm139_vm2, %v134_v37, %v136_v36 }
  0x9a   :  { %v160_v52 = vmul.f32 %v151_v38, %v141_v43 }
  0x9c   :  { %v166_v53 = vpop.permute.xlu1 %165  ;;  %v138_v54 = vpop.permute.xlu0 %137  ;;  %v163_v2 = vadd.f32 %v160_v52, %v131_v61 }
  0x9d   :  { %v140_v57 = vsel %vm139_vm2, %v136_v36, %v138_v54  ;;  %v142_v58 = vsel %vm139_vm2, %v138_v54, %v134_v37 }
  0x9e   :  { %v159_v62 = vmul.f32 %v147_v46, %v142_v58  ;;  %v161_v63 = vmul.f32 %v155_v47, %v140_v57 }
  0xa0   :  { %v170_v3 = vpop.permute.xlu1 %169  ;;  %v168_v4 = vpop.permute.xlu0 %167  ;;  %v162_v5 = vadd.f32 %v159_v62, %v130_v0  ;;  %v164_v7 = vadd.f32 %v161_v63, %v132_v1 }
  0xa1   :  { %v174_v6 = vsel %vm171_vm3, %v170_v3, %v166_v53  ;;  %v172_v9 = vsel %vm171_vm3, %v168_v4, %v170_v3  ;;  %v173_v10 = vsel %vm171_vm3, %v166_v53, %v168_v4 }
  0xa2   :  { %v191_v11 = vmul.f32 %v179_v49, %v174_v6  ;;  %v192_v12 = vmul.f32 %v183_v55, %v173_v10  ;;  %v193_v13 = vmul.f32 %v187_v59, %v172_v9 }
  0xa4   :  { %v194_v14 = vadd.f32 %v191_v11, %v162_v5  ;;  %v195_v15 = vadd.f32 %v192_v12, %v163_v2  ;;  %v196_v16 = vadd.f32 %v193_v13, %v164_v7 }
  0xa6   :  { %197 = vst [vmem:[#allocation7] sm:$0xff] %v194_v14  ;;  %198 = vst [vmem:[#allocation7 + $0x8] sm:$0xff] %v195_v15 }
  0xa7   :  { %199 = vst [vmem:[#allocation7 + $0x10] sm:$0xff] %v196_v16 }
  0xa8   :  { %274 = shalt.err (!%p271_p0)
}
  0xa9   :  { %209 = dma.vmem_to_hbm [thread:$0]  %s207_s22, 384, %s373_s2, [#allocation4]  }
  0xaa   :  { %287 = dma.done.wait [#allocation4], 384  }
  0xab   :  { %288 = vsyncadd [#allocation4], 4294966912 }
  0xac   :  { %213 = vsyncpa [#allocation3], 1 }
  0xad   :  { %214 = vsyncpa [#allocation6], 1 }
  0xae   :  { %215 = vsyncpa [#allocation4], 1 }

</bundles_post_ra>
